<compile_context>
chip_gen: v7x
topology: tpu7x:2x2x1
jax: 0.10.0
libtpu: 0.0.40
codegen_flags: <defaults>
</compile_context>

<pallas_src>
import functools

import jax
import jax.numpy as jnp
from jax.experimental import pallas as pl
from jax.experimental.pallas import tpu as pltpu


def logistic_regression_kernel(x_ref, w_ref, b_ref, o_ref):
    """One batch tile of sigmoid(x @ w^T + b).

    x_ref: (TM, D) io-dtype, VMEM (pipelined over the batch grid)
    w_ref: (1, D)  io-dtype, VMEM (constant index_map -> resident)
    b_ref: (1,)    f32,      SMEM scalar
    o_ref: (1, TM) f32,      VMEM (lane-dense output block)
    """
    tm = x_ref.shape[0]
    # Matvec on the MXU (vector-extended slot): contract dim 1 of x with dim 1
    # of w. No transpose of the big x tile, f32 accumulation, VPU/XLU stay free.
    z = jax.lax.dot_general(
        x_ref[...], w_ref[...],
        dimension_numbers=(((1,), (1,)), ((), ())),
        preferred_element_type=jnp.float32)                 # (TM, 1) f32
    # Relayout the small per-row result onto the lane axis so the epilogue
    # (bias + sigmoid) touches ~TM/1024 vregs and the store is an unmasked,
    # lane-dense vst instead of TM/8 masked vst.msk's.
    logits = z.reshape(1, tm) + b_ref[0]                    # (1, TM) f32
    # sigmoid(z) = 0.5*(tanh(z/2)+1): one EUP transcendental, no divide.
    o_ref[...] = (0.5 * (jnp.tanh(0.5 * logits) + 1.0)).astype(o_ref.dtype)


def _vmem_limit_bytes():
    """Generation-aware VMEM limit: 3/4 of physical per-core VMEM."""
    phys = 64 * 1024 * 1024  # conservative default = v7x per-TC VMEM
    try:
        info = pltpu.get_tpu_info()
        cap = getattr(info, "vmem_capacity_bytes", None)
        if cap:
            phys = int(cap)
    except Exception:
        pass
    # ~48 MiB on v7x (64 MiB phys), ~96 MiB on v5e/v6e (128 MiB phys).
    return (phys * 3) // 4


def _pick_batch_tile(batch, feature_dim, io_itemsize, vmem_budget_bytes):
    """Batch tile: stream ~4-8 MiB of x per grid step (per-step overhead is
    then a few % of DMA time), keep grid >= 2 (megacore sharding on v7x),
    stay within the VMEM budget, rows a multiple of 128."""
    if batch <= 256:
        return batch  # tiny: one block covering the full batch extent
    target_bytes = 8 * 1024 * 1024
    tm_target = max(128, target_bytes // max(feature_dim * io_itemsize, 1))
    # Double-buffered x block + compiler scratch for the lane-padded (tm, 1)
    # matmul result / relayout + (tiny) lane-dense output buffers.
    per_row = 2 * feature_dim * io_itemsize + 512 + 64
    tm_vmem = vmem_budget_bytes // per_row
    tm_half = max(128, (batch // 2) // 128 * 128)  # ensures >= 2 grid steps
    tm = min(tm_target, tm_vmem, 8192, tm_half)
    return max(128, (tm // 128) * 128)


@functools.partial(jax.jit, static_argnames=("io_dtype",))
def logistic_regression_forward(x, weight, bias, *, io_dtype=None):
    """x: (B, D), weight: (1, D) (PyTorch nn.Linear layout), bias: (1,).

    Returns sigmoid(x @ weight.T + bias) as (B, 1) float32.

    io_dtype defaults to x.dtype so the wrapper never adds an extra HBM cast
    pass; pass jnp.bfloat16 only to explicitly quantize the streamed inputs.
    """
    B, D = x.shape
    io_dtype = jnp.dtype(io_dtype) if io_dtype is not None else x.dtype
    x_io = x if x.dtype == io_dtype else x.astype(io_dtype)
    w_io = weight.reshape(1, D).astype(io_dtype)
    b_smem = bias.reshape(1).astype(jnp.float32)

    vmem_limit = _vmem_limit_bytes()
    tm = _pick_batch_tile(B, D, jnp.dtype(io_dtype).itemsize, vmem_limit // 2)
    num_tiles = pl.cdiv(B, tm)
    padded_b = num_tiles * tm

    out = pl.pallas_call(
        logistic_regression_kernel,
        out_shape=jax.ShapeDtypeStruct((1, padded_b), jnp.float32),
        grid=(num_tiles,),
        in_specs=[
            pl.BlockSpec((tm, D), lambda i: (i, 0)),            # x: streamed
            pl.BlockSpec((1, D), lambda i: (0, 0)),             # w: resident
            pl.BlockSpec(memory_space=pltpu.MemorySpace.SMEM),  # bias scalar
        ],
        out_specs=pl.BlockSpec((1, tm), lambda i: (0, i)),      # lane-dense
        compiler_params=pltpu.CompilerParams(
            dimension_semantics=("parallel",),
            vmem_limit_bytes=vmem_limit,
        ),
    )(x_io, w_io, b_smem)

    # Crop rows belonging to the padded last tile and restore (B, 1).
    return out[0, :B].reshape(B, 1)


if __name__ == "__main__":
    key = jax.random.PRNGKey(0)
    k_x, k_w, k_b = jax.random.split(key, 3)

    # ---- Small config matching the module: nn.Linear(input_dim, 1) ---------
    batch, input_dim = 8, 32
    x = jax.random.normal(k_x, (batch, input_dim), dtype=jnp.float32)
    bound = 1.0 / (input_dim ** 0.5)
    weight = jax.random.uniform(k_w, (1, input_dim), minval=-bound,
                                maxval=bound, dtype=jnp.float32)
    bias = jax.random.uniform(k_b, (1,), minval=-bound, maxval=bound,
                              dtype=jnp.float32)

    # f32 path (default: io_dtype follows x.dtype, no wrapper cast pass).
    out_f32 = jax.block_until_ready(
        logistic_regression_forward(x, weight, bias))
    ref_f32 = jax.nn.sigmoid(x @ weight.T + bias)
    assert out_f32.shape == (batch, 1)
    # Tolerance covers MXU internal precision for f32 operands.
    assert jnp.allclose(out_f32, ref_f32, atol=5e-3, rtol=5e-3)

    # Caller already holds bf16 activations: kernel streams bf16 natively.
    x_bf16 = x.astype(jnp.bfloat16)
    out_bf16 = jax.block_until_ready(
        logistic_regression_forward(x_bf16, weight, bias))
    x_b = x_bf16.astype(jnp.float32)
    w_b = weight.astype(jnp.bfloat16).astype(jnp.float32)
    ref_bf16 = jax.nn.sigmoid(x_b @ w_b.T + bias)
    assert out_bf16.shape == (batch, 1)
    assert jnp.allclose(out_bf16, ref_bf16, atol=1e-2, rtol=1e-2)

    # Gridded run: grid >= 2 ("parallel" batch axis), resident weight block,
    # MXU matvec, lane-dense output, B % tm != 0 handled via wrapper crop.
    B2, D2 = 4500, 512
    x2 = jax.random.normal(k_x, (B2, D2), dtype=jnp.float32)
    w2 = jax.random.uniform(k_w, (1, D2), minval=-0.05, maxval=0.05,
                            dtype=jnp.float32)
    out2 = jax.block_until_ready(
        logistic_regression_forward(x2, w2, bias))
    ref2 = jax.nn.sigmoid(x2 @ w2.T + bias)
    assert out2.shape == (B2, 1)
    assert jnp.allclose(out2, ref2, atol=5e-3, rtol=5e-3)

    print("KERNEL_OK")
</pallas_src>

<mosaic_0001>
module attributes {stable_mosaic.version = 11 : i64} {
  func.func @logistic_regression_kernel(%arg0: i32, %arg1: memref<8x32xf32, #tpu.memory_space<vmem>>, %arg2: memref<1x32xf32, #tpu.memory_space<vmem>>, %arg3: memref<1xf32, #tpu.memory_space<smem>>, %arg4: memref<1x8xf32, #tpu.memory_space<vmem>>) attributes {dimension_semantics = [#tpu.dimension_semantics<parallel>], iteration_bounds = array<i64: 1>, scalar_prefetch = 0 : i64, scratch_operands = 0 : i64, tpu.core_type = #tpu.core_type<tc>, window_params = [{transform_indices = @transform_0, window_bounds = array<i64: 8, 32>}, {pipeline_mode = #tpu.pipeline_mode<synchronous>, transform_indices = @transform_1, window_bounds = array<i64: 1, 32>}, {transform_indices = @transform_2, window_bounds = array<i64: 1>}, {transform_indices = @transform_3, window_bounds = array<i64: 1, 8>}]} {
    %c0 = arith.constant 0 : index
    %c0_0 = arith.constant 0 : index
    %0 = vector.load %arg1[%c0, %c0_0] : memref<8x32xf32, #tpu.memory_space<vmem>>, vector<8x32xf32>
    %c0_1 = arith.constant 0 : index
    %c0_2 = arith.constant 0 : index
    %1 = vector.load %arg2[%c0_1, %c0_2] : memref<1x32xf32, #tpu.memory_space<vmem>>, vector<1x32xf32>
    %cst = arith.constant dense<0.000000e+00> : vector<8x1xf32>
    %2 = tpu.matmul %0, %1, %cst {dimension_numbers = #tpu.dot_dimension_numbers<[1], [1], [0], [0], [0, 0, 1, 0], [], []>} : vector<8x32xf32>, vector<1x32xf32>, vector<8x1xf32> -> vector<8x1xf32>
    %3 = vector.shape_cast %2 : vector<8x1xf32> to vector<1x8xf32>
    %c0_3 = arith.constant 0 : index
    %4 = memref.load %arg3[%c0_3] : memref<1xf32, #tpu.memory_space<smem>>
    %5 = vector.broadcast %4 : f32 to vector<1x8xf32>
    %6 = arith.addf %3, %5 : vector<1x8xf32>
    %cst_4 = arith.constant 5.000000e-01 : f32
    %7 = vector.broadcast %cst_4 : f32 to vector<1x8xf32>
    %8 = arith.mulf %7, %6 : vector<1x8xf32>
    %9 = math.tanh %8 : vector<1x8xf32>
    %cst_5 = arith.constant 1.000000e+00 : f32
    %10 = vector.broadcast %cst_5 : f32 to vector<1x8xf32>
    %11 = arith.addf %9, %10 : vector<1x8xf32>
    %cst_6 = arith.constant 5.000000e-01 : f32
    %12 = vector.broadcast %cst_6 : f32 to vector<1x8xf32>
    %13 = arith.mulf %12, %11 : vector<1x8xf32>
    %c0_7 = arith.constant 0 : index
    %c0_8 = arith.constant 0 : index
    %14 = vector.load %arg4[%c0_7, %c0_8] : memref<1x8xf32, #tpu.memory_space<vmem>>, vector<1x8xf32>
    tpu.vector_store %arg4[%c0_7, %c0_8], %13 {strides = array<i32>} : memref<1x8xf32, #tpu.memory_space<vmem>>, vector<1x8xf32>,
    return
  }
  func.func @transform_0(%arg0: i32) -> (i32, i32) {
    %c0_i32 = arith.constant 0 : i32
    %c0_i32_0 = arith.constant 0 : i32
    return %arg0, %c0_i32 : i32, i32
  }
  func.func @transform_1(%arg0: i32) -> (i32, i32) {
    %c0_i32 = arith.constant 0 : i32
    %c0_i32_0 = arith.constant 0 : i32
    %c0_i32_1 = arith.constant 0 : i32
    return %c0_i32, %c0_i32_0 : i32, i32
  }
  func.func @transform_2(%arg0: i32) -> i32 {
    %c0_i32 = arith.constant 0 : i32
    %c0_i32_0 = arith.constant 0 : i32
    return %c0_i32 : i32
  }
  func.func @transform_3(%arg0: i32) -> (i32, i32) {
    %c0_i32 = arith.constant 0 : i32
    %c0_i32_0 = arith.constant 0 : i32
    return %c0_i32, %arg0 : i32, i32
  }
}

</mosaic_0001>

<bundles_post_ra>
// kernel: logistic_regression_forward.1
= control target key start
LH: loop header
LB: loop body
LE: loop exit
PB: predicated region body
PF: predicated region fallthrough
CT: control target
= control target key end

     0   :  { %9 = vsyncpa [#allocation4], 0  ;;  %s178_s0 = inlined_call_operand.hbm [shape: f32[8,32], index: 0, kind: input, shape index: {}]   ;;  %s179_s1 = inlined_call_operand.vmem [shape: f32[1,32], index: 1, kind: input, shape index: {}]   ;;  %s180_s2 = inlined_call_operand.<no memory space> [shape: f32[1], index: 2, kind: input, shape index: {}]   ;;  %s181_s3 = inlined_call_operand.hbm [shape: f32[1,8], index: 3, kind: output, shape index: {}]  }
   0x1   :  { %10 = vsyncpa [#allocation5], 0  ;;  %s126_s12 = smov [#allocation3]   ;;  %s78_s16 = scalar_lea.hbm %s178_s0, 128 }
   0x2   :  { %s17_s13 = sshll.u32 %s126_s12, 4  ;;  %p79_p0 = scmp.ne.s32.totalorder %s178_s0, %s78_s16  ;;  %s18_s13 = int_to_ptr.vmem [resolvable:$true] %s17_s13 }
   0x3   :  { %p82_p1 = scmp.lt.u32.totalorder %s78_s16, %s178_s0 }
   0x5   :  { %p84_p2 = pnand %p82_p1, %p79_p0 }
   0x7   :  { %87 = shalt.err (!%p84_p2)
}
   0x8   :  { %s88_s21 = scalar_lea.vmem %s18_s13, 128  ;;  %p93_p4 = scmp.lt.s32.totalorder %s18_s13, %s18_s13 }
   0x9   :  { %p89_p3 = scmp.ne.s32.totalorder %s18_s13, %s88_s21  ;;  %p94_p5 = scmp.lt.s32.totalorder %s88_s21, %s88_s21 }
   0xb   :  { %p95_p6 = por %p94_p5, %p93_p4 }
   0xd   :  { %p96_p7 = pnand %p95_p6, %p89_p3 }
   0xf   :  { %99 = shalt.err (!%p96_p7)
}
  0x10   :  { %20 = dma.hbm_to_vmem [thread:$0]  %s178_s0, 128, %s18_s13, [#allocation4]  }
  0x11   :  { %122 = dma.done.wait [#allocation4], 128  }
  0x12   :  { %123 = vsyncadd [#allocation4], 4294967168  ;;  %v28_v0 = vld [vmem:[#allocation3] sm:$0xff]  ;;  %vm37_vm0 = vcmask 261120   ;;  %v42_v4 = vstv %s180_s2  ;;  %v49_v8 = vlaneseq  ;;  %s127_s0 = smov [#allocation6]   ;;  %vm56_vm1 = vcmask 57344  }
  0x13   :  { %v73_v1 = vld [vmem:[%s179_s1] ss:$0 sm:$0xff]  ;;  %s64_s1 = sshll.u32 %s127_s0, 4  ;;  %s65_s1 = int_to_ptr.vmem [resolvable:$true] %s64_s1 }
  0x14   :  { %v36_v2 = vmul.f32 %v73_v1, %v28_v0  ;;  %v50_v9 = vand.u32 127, %v49_v8  ;;  %v52_v10 = vshrl.u32 %v49_v8, 7  ;;  %s100_s28 = scalar_lea.vmem %s65_s1, 16  ;;  %s104_s2 = scalar_lea.vmem %s65_s1, 32 }
  0x15   :  { %p101_p8 = scmp.ne.s32.totalorder %s65_s1, %s100_s28  ;;  %p105_p9 = scmp.lt.s32.totalorder %s65_s1, %s65_s1 }
  0x16   :  { %v38_v3 = vsel %vm37_vm0, %v36_v2, 0.0  ;;  %v53_v13 = vsub.s32 %v50_v9, %v52_v10  ;;  %p106_p10 = scmp.lt.s32.totalorder %s104_s2, %s100_s28 }
  0x17   :  { %39 = vadd.xlane.f32.xlu0 %v38_v3 }
  0x18   :  { %p107_p11 = por %p106_p10, %p105_p9 }
  0x1a   :  { %p108_p12 = pnand %p107_p11, %p101_p8 }
  0xa4   :  { %v40_v5 = vpop.xlane.xlu0 %39 }
  0xa5   :  { %v43_v6 = vadd.f32 %v42_v4, %v40_v5 }
  0xa7   :  { %v44_v7 = vmul.f32 0.5, %v43_v6 }
  0xa9   :  { %76 = vtanh.f32 %v44_v7 }
  0xb3   :  { %v77_v11 = vpop.eup %76 }
  0xb4   :  { %v46_v12 = vadd.f32 1.0, %v77_v11 }
  0xb6   :  { %v47_v14 = vmul.f32 0.5, %v46_v12 }
  0xb8   :  { %v54_v15 = vrot.slane %v47_v14, %v53_v13 }
  0xba   :  { %57 = vst.msk [vmem:[#allocation6] sm:$0x1] %vm56_vm1, %v54_v15 }
  0xbb   :  { %111 = shalt.err (!%p108_p12)
}
  0xbc   :  { %s112_s4 = scalar_lea.hbm %s181_s3, 16 }
  0xbd   :  { %p113_p13 = scmp.ne.s32.totalorder %s181_s3, %s112_s4  ;;  %p116_p0 = scmp.lt.u32.totalorder %s112_s4, %s181_s3 }
  0xbf   :  { %p118_p1 = pnand %p116_p0, %p113_p13 }
  0xc1   :  { %121 = shalt.err (!%p118_p1)
}
  0xc2   :  { %67 = dma.vmem_to_hbm [thread:$0]  %s65_s1, 16, %s181_s3, [#allocation5]  }
  0xc3   :  { %124 = dma.done.wait [#allocation5], 16  }
  0xc4   :  { %125 = vsyncadd [#allocation5], 4294967280 }
  0xc5   :  { %71 = vsyncpa [#allocation4], 1 }
  0xc6   :  { %72 = vsyncpa [#allocation5], 1 }

</bundles_post_ra>
